<compile_context>
chip_gen: v5e
topology: v5e:2x2
jax: 0.10.0
libtpu: 0.0.40
codegen_flags: <defaults>
</compile_context>

<pallas_src>
import jax
import jax.numpy as jnp
from jax.experimental import pallas as pl
from jax.experimental.pallas import tpu as pltpu


def _patch_embed_kernel(feat_ref, w_ref, bias_pos_ref, out_ref):
    """One (batch, N-tile) grid step.

    feat_ref:     (C, TILE_N)  channels-first feature slab (batch dim squeezed)
    w_ref:        (C, H)       1x1-conv weight (squeezed + transposed)
    bias_pos_ref: (1, H)       conv bias + position row, f32
    out_ref:      (TILE_N, H)
    """
    # lhs-transposed matmul: contract the C axis of both operands on the MXU.
    acc = jax.lax.dot_general(
        feat_ref[...], w_ref[...],
        dimension_numbers=(((0,), (0,)), ((), ())),
        preferred_element_type=jnp.float32,
    )
    out_ref[...] = (acc + bias_pos_ref[...]).astype(out_ref.dtype)


def embeddings_forward(feat_nchw, conv_w, conv_b, cls_token, pos_emb, *,
                       tile_n=1024, vmem_budget_bytes=48 * 1024 * 1024):
    """feat_nchw: (B, C, Hs, Ws) backbone feature map (PyTorch NCHW convention).
       conv_w:    (hidden, C, 1, 1)   (PyTorch Conv2d weight shape)
       conv_b:    (hidden,)
       cls_token: (1, 1, hidden)
       pos_emb:   (1, n_patches+1, hidden)
    Returns (B, N+1, hidden).
    """
    B, C, Hs, Ws = feat_nchw.shape
    N = Hs * Ws
    hidden = conv_w.shape[0]
    seq = N + 1

    # PyTorch would raise on OOB; JAX clamps silently -> assert explicitly.
    assert seq < pos_emb.shape[1], (
        f"position_embeddings[:, {seq}, :] out of range for {pos_emb.shape}")

    # Free reshape only -- no channels-last transpose pass over HBM.
    feat = feat_nchw.reshape(B, C, N)
    # Squeeze 1x1 conv weight to (C, hidden) (tiny tensor).
    w = jnp.transpose(conv_w.reshape(hidden, C), (1, 0))

    # Reproduce the exact PyTorch indexing: position_embeddings[:, x.shape[1], :]
    pos_row = pos_emb[:, seq, :].reshape(1, hidden).astype(jnp.float32)
    # Pre-fuse the constant row vectors; keep f32 for the f32 accumulator.
    bias_plus_pos = conv_b.reshape(1, hidden).astype(jnp.float32) + pos_row

    itemsize = jnp.dtype(feat.dtype).itemsize
    lane = 128

    # --- N-tile selection (lane-aligned, VMEM-budget-aware, megacore-aware) ---
    if N <= lane:
        tn = N                                     # full dim: (8,128) rule satisfied
    else:
        tn = max(lane, (min(tile_n, N) // lane) * lane)
        # Double-buffered footprint: feat col + out row per N element, plus weight.
        fixed = 2 * C * hidden * itemsize + 2 * hidden * 4
        per_n = 2 * (C + hidden) * itemsize
        tn_budget = max(lane, ((vmem_budget_bytes - fixed) // per_n // lane) * lane)
        tn = min(tn, tn_budget)
        if B == 1:
            # Guarantee >= 2 grid steps so v7x's second TensorCore participates.
            half = -(-N // 2)
            half = max(lane, -(-half // lane) * lane)
            tn = min(tn, half)
    n_tiles = pl.cdiv(N, tn)

    # Actual double-buffered VMEM footprint + headroom (capped well under 128 MiB).
    footprint = (2 * C * tn * itemsize            # feat blocks
                 + 2 * tn * hidden * itemsize     # out blocks
                 + 2 * C * hidden * itemsize      # weight
                 + 2 * hidden * 4)                # bias+pos row
    vmem_limit = int(min(100 * 1024 * 1024,
                         max(footprint + 8 * 1024 * 1024, 32 * 1024 * 1024)))

    cost = pl.CostEstimate(
        flops=2 * B * N * C * hidden,
        transcendentals=0,
        bytes_accessed=itemsize * (B * N * C + C * hidden + B * N * hidden),
    )

    patches = pl.pallas_call(
        _patch_embed_kernel,
        out_shape=jax.ShapeDtypeStruct((B, N, hidden), feat.dtype),
        grid_spec=pltpu.PrefetchScalarGridSpec(
            num_scalar_prefetch=0,
            grid=(B, n_tiles),
            in_specs=[
                # batch dim squeezed; contract-from-HBM layout (C, tn)
                pl.BlockSpec((None, C, tn), lambda b, j: (b, 0, j)),
                pl.BlockSpec((C, hidden), lambda b, j: (0, 0)),
                pl.BlockSpec((1, hidden), lambda b, j: (0, 0)),
            ],
            out_specs=pl.BlockSpec((None, tn, hidden), lambda b, j: (b, j, 0)),
        ),
        compiler_params=pltpu.CompilerParams(
            dimension_semantics=("parallel", "parallel"),
            vmem_limit_bytes=vmem_limit,
        ),
        cost_estimate=cost,
    )(feat, w, bias_plus_pos)

    # Batch-invariant cls row: built once here, not per grid step.
    cls_row = (cls_token.reshape(1, hidden).astype(jnp.float32)
               + pos_row).astype(patches.dtype)
    cls_rows = jnp.broadcast_to(cls_row[None, :, :], (B, 1, hidden))
    return jnp.concatenate([cls_rows, patches], axis=1)


def _reference(feat_nchw, conv_w, conv_b, cls_token, pos_emb):
    B, C, Hs, Ws = feat_nchw.shape
    N = Hs * Ws
    hidden = conv_w.shape[0]
    feat = jnp.transpose(feat_nchw.reshape(B, C, N), (0, 2, 1))       # (B, N, C)
    w = jnp.transpose(conv_w.reshape(hidden, C), (1, 0))              # (C, hidden)
    p = jnp.einsum("bnc,ch->bnh", feat, w) + conv_b[None, None, :]
    cls = jnp.broadcast_to(cls_token, (B, 1, hidden))
    x = jnp.concatenate([cls, p], axis=1)                             # (B, N+1, hidden)
    return x + pos_emb[:, x.shape[1], :][:, None, :]


if __name__ == "__main__":
    # Small shapes: backbone feature map (B=2, C=256, 4x4 spatial) -> 16 patches,
    # hidden=128, n_patches=192 (module default) so pos_emb has 193 rows and the
    # literal index `x.shape[1] == 17` used by the PyTorch code is valid.
    B, C, Hs, Ws = 2, 256, 4, 4
    hidden = 128
    n_patches = 192

    key = jax.random.PRNGKey(0)
    k0, k1, k2, k3, k4 = jax.random.split(key, 5)
    feat = jax.random.normal(k0, (B, C, Hs, Ws), dtype=jnp.float32)
    conv_w = jax.random.normal(k1, (hidden, C, 1, 1), dtype=jnp.float32) * 0.02
    conv_b = jax.random.normal(k2, (hidden,), dtype=jnp.float32) * 0.02
    # nn.Parameter(torch.zeros(...)) in __init__; use small deterministic randoms
    # here so the broadcast-adds are actually exercised.
    cls_token = jax.random.normal(k3, (1, 1, hidden), dtype=jnp.float32) * 0.02
    pos_emb = jax.random.normal(k4, (1, n_patches + 1, hidden), dtype=jnp.float32) * 0.02

    out = embeddings_forward(feat, conv_w, conv_b, cls_token, pos_emb)
    out = jax.block_until_ready(out)

    ref = _reference(feat, conv_w, conv_b, cls_token, pos_emb)
    assert out.shape == (B, Hs * Ws + 1, hidden), out.shape
    assert jnp.allclose(out, ref, rtol=1e-4, atol=1e-4), "mismatch vs reference"

    print("KERNEL_OK")
</pallas_src>

<mosaic_0001>
module attributes {stable_mosaic.version = 11 : i64} {
  func.func @_patch_embed_kernel(%arg0: i32, %arg1: i32, %arg2: memref<1x256x16xf32, #tpu.memory_space<vmem>>, %arg3: memref<256x128xf32, #tpu.memory_space<vmem>>, %arg4: memref<1x128xf32, #tpu.memory_space<vmem>>, %arg5: memref<1x16x128xf32, #tpu.memory_space<vmem>>) attributes {dimension_semantics = [#tpu.dimension_semantics<parallel>, #tpu.dimension_semantics<parallel>], iteration_bounds = array<i64: 2, 1>, scalar_prefetch = 0 : i64, scratch_operands = 0 : i64, tpu.core_type = #tpu.core_type<tc>, window_params = [{transform_indices = @transform_0, window_bounds = array<i64: 1, 256, 16>}, {pipeline_mode = #tpu.pipeline_mode<synchronous>, transform_indices = @transform_1, window_bounds = array<i64: 256, 128>}, {pipeline_mode = #tpu.pipeline_mode<synchronous>, transform_indices = @transform_2, window_bounds = array<i64: 1, 128>}, {transform_indices = @transform_3, window_bounds = array<i64: 1, 16, 128>}]} {
    %c0 = arith.constant 0 : index
    %c0_0 = arith.constant 0 : index
    %c0_1 = arith.constant 0 : index
    %0 = vector.load %arg2[%c0, %c0_0, %c0_1] : memref<1x256x16xf32, #tpu.memory_space<vmem>>, vector<1x256x16xf32>
    %1 = vector.shape_cast %0 : vector<1x256x16xf32> to vector<256x16xf32>
    %c0_2 = arith.constant 0 : index
    %c0_3 = arith.constant 0 : index
    %2 = vector.load %arg3[%c0_2, %c0_3] : memref<256x128xf32, #tpu.memory_space<vmem>>, vector<256x128xf32>
    %cst = arith.constant dense<0.000000e+00> : vector<16x128xf32>
    %3 = tpu.matmul %1, %2, %cst {dimension_numbers = #tpu.dot_dimension_numbers<[0], [0], [1], [1], [0, 1, 1, 1], [], []>} : vector<256x16xf32>, vector<256x128xf32>, vector<16x128xf32> -> vector<16x128xf32>
    %c0_4 = arith.constant 0 : index
    %c0_5 = arith.constant 0 : index
    %4 = vector.load %arg4[%c0_4, %c0_5] : memref<1x128xf32, #tpu.memory_space<vmem>>, vector<1x128xf32>
    %5 = vector.broadcast %4 : vector<1x128xf32> to vector<16x128xf32>
    %6 = arith.addf %3, %5 : vector<16x128xf32>
    %c0_6 = arith.constant 0 : index
    %c0_7 = arith.constant 0 : index
    %c0_8 = arith.constant 0 : index
    %7 = vector.load %arg5[%c0_6, %c0_7, %c0_8] : memref<1x16x128xf32, #tpu.memory_space<vmem>>, vector<1x16x128xf32>
    %8 = vector.shape_cast %7 : vector<1x16x128xf32> to vector<16x128xf32>
    %9 = vector.shape_cast %6 : vector<16x128xf32> to vector<1x16x128xf32>
    tpu.vector_store %arg5[%c0_6, %c0_7, %c0_8], %9 {strides = array<i32>} : memref<1x16x128xf32, #tpu.memory_space<vmem>>, vector<1x16x128xf32>,
    return
  }
  func.func @transform_0(%arg0: i32, %arg1: i32) -> (i32, i32, i32) {
    %c0_i32 = arith.constant 0 : i32
    %c0_i32_0 = arith.constant 0 : i32
    return %arg0, %c0_i32, %arg1 : i32, i32, i32
  }
  func.func @transform_1(%arg0: i32, %arg1: i32) -> (i32, i32) {
    %c0_i32 = arith.constant 0 : i32
    %c0_i32_0 = arith.constant 0 : i32
    %c0_i32_1 = arith.constant 0 : i32
    return %c0_i32, %c0_i32_0 : i32, i32
  }
  func.func @transform_2(%arg0: i32, %arg1: i32) -> (i32, i32) {
    %c0_i32 = arith.constant 0 : i32
    %c0_i32_0 = arith.constant 0 : i32
    %c0_i32_1 = arith.constant 0 : i32
    return %c0_i32, %c0_i32_0 : i32, i32
  }
  func.func @transform_3(%arg0: i32, %arg1: i32) -> (i32, i32, i32) {
    %c0_i32 = arith.constant 0 : i32
    %c0_i32_0 = arith.constant 0 : i32
    return %arg0, %arg1, %c0_i32 : i32, i32, i32
  }
}

</mosaic_0001>

<bundles_post_ra>
// kernel: tpu_custom_call.1
= control target key start
LH: loop header
LB: loop body
LE: loop exit
PB: predicated region body
PF: predicated region fallthrough
CT: control target
= control target key end

     0   :  { %8 = vsyncpa [#allocation3], 0  ;;  %s951_s0 = inlined_call_operand.vmem [shape: f32[2,256,16], index: 0, kind: input, shape index: {}]   ;;  %s952_s1 = inlined_call_operand.vmem [shape: f32[256,128], index: 1, kind: input, shape index: {}]   ;;  %s953_s2 = inlined_call_operand.vmem [shape: f32[1,128], index: 2, kind: input, shape index: {}]   ;;  %s954_s3 = inlined_call_operand.hbm [shape: f32[2,16,128], index: 3, kind: output, shape index: {}]  }
   0x1   :  { %10 = vsyncpa [#allocation3 + $0x1], 0  ;;  %s721_s12 = smov 0   ;;  %s723_s13 = smov 0  }
   0x2   :  { %s725_s14 = smov 0   ;;  %s727_s15 = smov 0  }
   0x3   :  { %s729_s16 = smov 0   ;;  %s731_s17 = smov 0  }
   0x4 LB: > { %s472_s18 = sadd.s32 4294967295, %s697_s17   ;;  %s473_s19 = sadd.s32 4294967294, %s697_s17   ;;  %s697_s17 = sphi %s731_s17, %s16_s17   ;;  %s693_s16 = sphi %s729_s16, %s961_s16   ;;  %s689_s15 = sphi %s727_s15, %s960_s15   ;;  %s685_s14 = sphi %s725_s14, %s959_s14   ;;  %s681_s13 = sphi %s723_s13, %s958_s13   ;;  %s677_s12 = sphi %s721_s12, %s957_s12  }
   0x5   : > { %s28_s20 = sadd.s32 1, %s693_s16  ;;  %s107_s21 = sadd.s32 1, %s685_s14 }
   0x6   : > { %p30_p0 = scmp.ge.s32.totalorder %s28_s20, 2  ;;  %p117_p1 = scmp.ne.s32.totalorder %s685_s14, %s681_s13 }
   0x7   : > { %p118_p2 = scmp.eq.s32.totalorder %s472_s18, 1  ;;  %p123_p3 = scmp.ne.s32.totalorder %s681_s13, %s677_s12 }
   0x8   : > { %s963_s20 = smov (%p30_p0, %s28_s20), 0  ;;  %p124_p5 = scmp.eq.s32.totalorder %s473_s19, 1 }
   0x9   : > { %p761_p4 = por %p118_p2, %p117_p1  ;;  %s102_s23 = ssub.s32 %s693_s16, %s963_s20 }
   0xa   : > { %p476_p6 = scmp.ge.s32.totalorder %s697_s17, 1  ;;  %p105_p7 = scmp.eq.s32.totalorder %s102_s23, 0 }
   0xb   : > { %p768_p8 = por %p124_p5, %p123_p3  ;;  %p159_p9 = scmp.lt.s32.totalorder %s697_s17, 3 }
   0xc   : > { %s774_s25 = scalar_select %p105_p7, %s685_s14, %s107_s21  }
   0xd   : > { %p160_p10 = pnand %p476_p6, %p159_p9 }
   0xe   : > { %p186_p11 = scmp.lt.s32.totalorder (!%p160_p10), %s689_s15, 1  ;;  %s183_s29 = sand.u32 (!%p160_p10), 1, %s681_s13  }
   0xf   : > { %163 = sbr.rel (%p160_p10) target bundleno = 343 (0x157), region = 32  ;;  %s477_s6 = sshll.u32 (!%p160_p10), %s183_s29, 4 }
  0x10   : > { %s185_s7 = scalar_lea.vmem (!%p160_p10), [#allocation2], %s477_s6  ;;  %s486_s8 = sshll.u32 (!%p160_p10), %s689_s15, 4 }
  0x11   : > { %s389_s11 = scalar_lea.hbm (!%p160_p10), %s954_s3, %s486_s8  ;;  %s390_s18 = sshll.u32 (!%p160_p10), %s185_s7, 4  ;;  %s391_s18 = int_to_ptr.vmem [resolvable:$true] %s390_s18 }
  0x12   : > { %s392_s19 = sshll.u32 (!%p160_p10), %s389_s11, 4  ;;  %s376_s21 = scalar_lea.sflag (!%p160_p10), [#allocation3], %s183_s29  ;;  %s393_s19 = int_to_ptr.hbm [resolvable:$true] %s392_s19 }
  0x13   : > { %s633_s23 = sshra.s32 (!%p160_p10), %s393_s19, 4  ;;  %s634_s23 = int_to_ptr.hbm [resolvable:$true] %s633_s23 }
  0x14   : > { %s187_s26 = scalar_select %p186_p11, %s689_s15, 1  ;;  %v242_v36 = vld [vmem:[%s952_s1 + $0x78] sm:$0xff]  ;;  %v241_v38 = vld [vmem:[%s952_s1 + $0x70] sm:$0xff]  ;;  %v240_v42 = vld [vmem:[%s952_s1 + $0x68] sm:$0xff] }
  0x15   : > { %v258_v37 = vld [vmem:[%s952_s1 + $0xf8] sm:$0xff]  ;;  %327 = vmatpush.msra.mxu0 %v242_v36  ;;  %v257_v41 = vld [vmem:[%s952_s1 + $0xf0] sm:$0xff]  ;;  %v256_v43 = vld [vmem:[%s952_s1 + $0xe8] sm:$0xff]  ;;  %487 = vmatpush.msra.mxu2 %v242_v36  ;;  %p640_p1 = scmp.lt.s32.totalorder %s634_s23, %s954_s3 }
  0x16   : > { %s485_s27 = sshll.u32 %s187_s26, 8  ;;  %350 = vmatpush.msra.mxu1 %v258_v37  ;;  %503 = vmatpush.msra.mxu3 %v258_v37  ;;  %v239_v45 = vld [vmem:[%s952_s1 + $0x60] sm:$0xff]  ;;  %v238_v47 = vld [vmem:[%s952_s1 + $0x58] sm:$0xff]  ;;  %v237_v49 = vld [vmem:[%s952_s1 + $0x50] sm:$0xff] }
  0x17   : > { %s781_s30 = scalar_lea.vmem %s951_s0, %s485_s27  ;;  %328 = vmatpush.msra.mxu0 %v241_v38  ;;  %v255_v46 = vld [vmem:[%s952_s1 + $0xe0] sm:$0xff]  ;;  %488 = vmatpush.msra.mxu2 %v241_v38  ;;  %v254_v48 = vld [vmem:[%s952_s1 + $0xd8] sm:$0xff]  ;;  %v253_v50 = vld [vmem:[%s952_s1 + $0xd0] sm:$0xff]  ;;  %s639_s27 = scalar_lea.hbm %s954_s3, 32 }
  0x18   : > { %v195_v0 = vld [vmem:[%s781_s30] sm:$0xff]  ;;  %v196_v3 = vld [vmem:[%s781_s30 + $0x8] sm:$0xff]  ;;  %v197_v6 = vld [vmem:[%s781_s30 + $0x10] sm:$0xff]  ;;  %351 = vmatpush.msra.mxu1 %v257_v41  ;;  %504 = vmatpush.msra.mxu3 %v257_v41 }
  0x19   : > { %v211_v1 = vld [vmem:[%s781_s30 + $0x80] sm:$0xff]  ;;  %v212_v4 = vld [vmem:[%s781_s30 + $0x88] sm:$0xff]  ;;  %v213_v7 = vld [vmem:[%s781_s30 + $0x90] sm:$0xff]  ;;  %329 = vmatpush.msra.mxu0 %v240_v42  ;;  %489 = vmatpush.msra.mxu2 %v240_v42 }
  0x1a   : > { %v576_v2 = vpack.i.bf16 %v211_v1, %v195_v0  ;;  %v578_v5 = vpack.i.bf16 %v212_v4, %v196_v3  ;;  %v580_v8 = vpack.i.bf16 %v213_v7, %v197_v6  ;;  %v198_v9 = vld [vmem:[%s781_s30 + $0x18] sm:$0xff]  ;;  %v199_v12 = vld [vmem:[%s781_s30 + $0x20] sm:$0xff]  ;;  %v200_v15 = vld [vmem:[%s781_s30 + $0x28] sm:$0xff]  ;;  %352 = vmatpush.msra.mxu1 %v256_v43  ;;  %505 = vmatpush.msra.mxu3 %v256_v43 }
  0x1b   : > { %v214_v10 = vld [vmem:[%s781_s30 + $0x98] sm:$0xff]  ;;  %v215_v13 = vld [vmem:[%s781_s30 + $0xa0] sm:$0xff]  ;;  %v216_v16 = vld [vmem:[%s781_s30 + $0xa8] sm:$0xff]  ;;  %330 = vmatpush.msra.mxu0 %v239_v45  ;;  %490 = vmatpush.msra.mxu2 %v239_v45 }
  0x1c   : > { %577 = vxpose.xlu0.b32.start [1/16] (narrow) %v576_v2, 16  ;;  %v582_v11 = vpack.i.bf16 %v214_v10, %v198_v9  ;;  %v584_v14 = vpack.i.bf16 %v215_v13, %v199_v12  ;;  %v586_v17 = vpack.i.bf16 %v216_v16, %v200_v15  ;;  %v201_v18 = vld [vmem:[%s781_s30 + $0x30] sm:$0xff]  ;;  %v202_v21 = vld [vmem:[%s781_s30 + $0x38] sm:$0xff]  ;;  %v203_v24 = vld [vmem:[%s781_s30 + $0x40] sm:$0xff]  ;;  %353 = vmatpush.msra.mxu1 %v255_v46 }
  0x1d   : > { %v217_v19 = vld [vmem:[%s781_s30 + $0xb0] sm:$0xff]  ;;  %v218_v22 = vld [vmem:[%s781_s30 + $0xb8] sm:$0xff]  ;;  %v219_v25 = vld [vmem:[%s781_s30 + $0xc0] sm:$0xff]  ;;  %331 = vmatpush.msra.mxu0 %v238_v47  ;;  %506 = vmatpush.msra.mxu3 %v255_v46 }
  0x1e   : > { %v588_v20 = vpack.i.bf16 %v217_v19, %v201_v18  ;;  %v590_v23 = vpack.i.bf16 %v218_v22, %v202_v21  ;;  %v592_v26 = vpack.i.bf16 %v219_v25, %v203_v24  ;;  %v204_v27 = vld [vmem:[%s781_s30 + $0x48] sm:$0xff]  ;;  %v205_v30 = vld [vmem:[%s781_s30 + $0x50] sm:$0xff]  ;;  %v206_v33 = vld [vmem:[%s781_s30 + $0x58] sm:$0xff]  ;;  %354 = vmatpush.msra.mxu1 %v254_v48  ;;  %491 = vmatpush.msra.mxu2 %v238_v47 }
  0x1f   : > { %v220_v28 = vld [vmem:[%s781_s30 + $0xc8] sm:$0xff]  ;;  %v221_v31 = vld [vmem:[%s781_s30 + $0xd0] sm:$0xff]  ;;  %v222_v34 = vld [vmem:[%s781_s30 + $0xd8] sm:$0xff]  ;;  %332 = vmatpush.msra.mxu0 %v237_v49  ;;  %507 = vmatpush.msra.mxu3 %v254_v48 }
  0x20   : > { %v594_v29 = vpack.i.bf16 %v220_v28, %v204_v27  ;;  %v596_v32 = vpack.i.bf16 %v221_v31, %v205_v30  ;;  %v598_v35 = vpack.i.bf16 %v222_v34, %v206_v33  ;;  %v207_v39 = vld [vmem:[%s781_s30 + $0x60] sm:$0xff]  ;;  %v208_v51 = vld [vmem:[%s781_s30 + $0x68] sm:$0xff]  ;;  %355 = vmatpush.msra.mxu1 %v253_v50  ;;  %492 = vmatpush.msra.mxu2 %v237_v49  ;;  %v234_v58 = vld [vmem:[%s952_s1 + $0x38] sm:$0xff] }
  0x21   : > { %v223_v40 = vld [vmem:[%s781_s30 + $0xe0] sm:$0xff]  ;;  %v224_v52 = vld [vmem:[%s781_s30 + $0xe8] sm:$0xff]  ;;  %v250_v59 = vld [vmem:[%s952_s1 + $0xb8] sm:$0xff]  ;;  %508 = vmatpush.msra.mxu3 %v253_v50 }
  0x22   : > { %v600_v44 = vpack.i.bf16 %v223_v40, %v207_v39  ;;  %v236_v53 = vld [vmem:[%s952_s1 + $0x48] sm:$0xff]  ;;  %v602_v55 = vpack.i.bf16 %v224_v52, %v208_v51  ;;  %v235_v56 = vld [vmem:[%s952_s1 + $0x40] sm:$0xff]  ;;  %v233_v60 = vld [vmem:[%s952_s1 + $0x30] sm:$0xff] }
  0x23   : > { %v252_v54 = vld [vmem:[%s952_s1 + $0xc8] sm:$0xff]  ;;  %v251_v57 = vld [vmem:[%s952_s1 + $0xc0] sm:$0xff]  ;;  %333 = vmatpush.msra.mxu0 %v236_v53  ;;  %493 = vmatpush.msra.mxu2 %v236_v53  ;;  %v249_v61 = vld [vmem:[%s952_s1 + $0xb0] sm:$0xff] }
  0x24   : > { %579 = vxpose.xlu0.b32.cont [2/16] (narrow) %v578_v5, 16  ;;  %356 = vmatpush.msra.mxu1 %v252_v54  ;;  %v209_v62 = vld [vmem:[%s781_s30 + $0x70] sm:$0xff]  ;;  %v232_v0 = vld [vmem:[%s952_s1 + $0x28] sm:$0xff]  ;;  %v231_v3 = vld [vmem:[%s952_s1 + $0x20] sm:$0xff] }
  0x25   : > { %334 = vmatpush.msra.mxu0 %v235_v56  ;;  %509 = vmatpush.msra.mxu3 %v252_v54  ;;  %v225_v63 = vld [vmem:[%s781_s30 + $0xf0] sm:$0xff]  ;;  %v248_v1 = vld [vmem:[%s952_s1 + $0xa8] sm:$0xff]  ;;  %v247_v4 = vld [vmem:[%s952_s1 + $0xa0] sm:$0xff] }
  0x26   : > { %357 = vmatpush.msra.mxu1 %v251_v57  ;;  %494 = vmatpush.msra.mxu2 %v235_v56  ;;  %v604_v2 = vpack.i.bf16 %v225_v63, %v209_v62  ;;  %v230_v5 = vld [vmem:[%s952_s1 + $0x18] sm:$0xff]  ;;  %v229_v7 = vld [vmem:[%s952_s1 + $0x10] sm:$0xff]  ;;  %v244_v12 = vld [vmem:[%s952_s1 + $0x88] sm:$0xff] }
  0x27   : > { %335 = vmatpush.msra.mxu0 %v234_v58  ;;  %510 = vmatpush.msra.mxu3 %v251_v57  ;;  %v246_v6 = vld [vmem:[%s952_s1 + $0x98] sm:$0xff]  ;;  %v243_v15 = vld [vmem:[%s952_s1 + $0x80] sm:$0xff] }
  0x28   : > { %358 = vmatpush.msra.mxu1 %v250_v59  ;;  %495 = vmatpush.msra.mxu2 %v234_v58  ;;  %v210_v9 = vld [vmem:[%s781_s30 + $0x78] sm:$0xff]  ;;  %v618_v22 = vld [vmem:[%s953_s2] ss:$0 sm:$0xff] }
  0x29   : > { %336 = vmatpush.msra.mxu0 %v233_v60  ;;  %511 = vmatpush.msra.mxu3 %v250_v59  ;;  %v226_v10 = vld [vmem:[%s781_s30 + $0xf8] sm:$0xff]  ;;  %s635_s30 = scalar_lea.hbm %s634_s23, 16 }
  0x2a   : > { %359 = vmatpush.msra.mxu1 %v249_v61  ;;  %496 = vmatpush.msra.mxu2 %v233_v60  ;;  %v606_v13 = vpack.i.bf16 %v226_v10, %v210_v9  ;;  %p636_p12 = scmp.ne.s32.totalorder %s634_s23, %s635_s30  ;;  %p641_p2 = scmp.lt.s32.totalorder %s639_s27, %s635_s30 }
  0x2b   : > { %337 = vmatpush.msra.mxu0 %v232_v0  ;;  %512 = vmatpush.msra.mxu3 %v249_v61 }
  0x2c   : > { %581 = vxpose.xlu0.b32.cont [3/16] (narrow) %v580_v8, 16  ;;  %360 = vmatpush.msra.mxu1 %v248_v1  ;;  %v245_v8 = vld [vmem:[%s952_s1 + $0x90] sm:$0xff]  ;;  %p637_p13 = pnand %p636_p12, %p761_p4  ;;  %p642_p3 = por %p641_p2, %p640_p1 }
  0x2d   : > { %338 = vmatpush.msra.mxu0 %v231_v3  ;;  %497 = vmatpush.msra.mxu2 %v232_v0 }
  0x2e   : > { %361 = vmatpush.msra.mxu1 %v247_v4  ;;  %513 = vmatpush.msra.mxu3 %v248_v1  ;;  %p638_p0 = pneg %p637_p13 }
  0x2f   : > { %339 = vmatpush.msra.mxu0 %v230_v5  ;;  %498 = vmatpush.msra.mxu2 %v231_v3 }
  0x30   : > { %362 = vmatpush.msra.mxu1 %v246_v6  ;;  %514 = vmatpush.msra.mxu3 %v247_v4  ;;  %p643_p5 = pnand %p642_p3, %p638_p0 }
  0x31   : > { %340 = vmatpush.msra.mxu0 %v229_v7  ;;  %499 = vmatpush.msra.mxu2 %v230_v5 }
  0x32   : > { %363 = vmatpush.msra.mxu1 %v245_v8  ;;  %515 = vmatpush.msra.mxu3 %v246_v6 }
  0x33   : > { %500 = vmatpush.msra.mxu2 %v229_v7 }
  0x34   : > { %583 = vxpose.xlu0.b32.cont [4/16] (narrow) %v582_v11, 16  ;;  %v228_v11 = vld [vmem:[%s952_s1 + $0x8] sm:$0xff]  ;;  %364 = vmatpush.msra.mxu1 %v244_v12 }
  0x35   : > { %341 = vmatpush.msra.mxu0 %v228_v11  ;;  %516 = vmatpush.msra.mxu3 %v245_v8 }
  0x36   : > { %501 = vmatpush.msra.mxu2 %v228_v11  ;;  %365 = vmatpush.msra.mxu1 %v243_v15 }
  0x37   : > { %517 = vmatpush.msra.mxu3 %v244_v12 }
  0x39   : > { %518 = vmatpush.msra.mxu3 %v243_v15 }
  0x3c   : > { %585 = vxpose.xlu0.b32.cont [5/16] (narrow) %v584_v14, 16  ;;  %v227_v14 = vld [vmem:[%s952_s1] sm:$0xff] }
  0x3d   : > { %342 = vmatpush.msra.mxu0 %v227_v14  ;;  %502 = vmatpush.msra.mxu2 %v227_v14 }
  0x44   : > { %587 = vxpose.xlu0.b32.cont [6/16] (narrow) %v586_v17, 16 }
  0x4c   : > { %589 = vxpose.xlu0.b32.cont [7/16] (narrow) %v588_v20, 16 }
  0x54   : > { %591 = vxpose.xlu0.b32.cont [8/16] (narrow) %v590_v23, 16 }
  0x5c   : > { %593 = vxpose.xlu0.b32.cont [9/16] (narrow) %v592_v26, 16 }
  0x64   : > { %595 = vxpose.xlu0.b32.cont [10/16] (narrow) %v594_v29, 16 }
  0x6c   : > { %597 = vxpose.xlu0.b32.cont [11/16] (narrow) %v596_v32, 16 }
  0x74   : > { %599 = vxpose.xlu0.b32.cont [12/16] (narrow) %v598_v35, 16 }
  0x7c   : > { %601 = vxpose.xlu0.b32.cont [13/16] (narrow) %v600_v44, 16 }
  0x84   : > { %603 = vxpose.xlu0.b32.cont [14/16] (narrow) %v602_v55, 16 }
  0x8c   : > { %605 = vxpose.xlu0.b32.cont [15/16] (narrow) %v604_v2, 16 }
  0x94   : > { %607 = vxpose.xlu0.b32.end [16/16] (narrow) %v606_v13, 16 }
  0xc0   : > { %v608_v16 = vpop.trf.xlu0 }
  0xc1   : > { %v609_v17 = vunpack.i.l.bf16 %v608_v16  ;;  %v612_v18 = vunpack.i.h.bf16 %v608_v16 }
  0xc3   : > { %343 = vmatmul.f32.vlgmr.msra.gmra.mxu0 %v609_v17  ;;  %366 = vmatmul.f32.vlgmr.msra.gmra.mxu1 %v612_v18 }
  0xc8   : > { %v613_v19 = vpop.trf.xlu0 }
  0xc9   : > { %v614_v20 = vunpack.i.l.bf16 %v613_v19  ;;  %v617_v21 = vunpack.i.h.bf16 %v613_v19 }
  0xcb   : > { %346 = vmatmul.f32.vlgmr.msra.gmra.mxu2 %v614_v20  ;;  %369 = vmatmul.f32.vlgmr.msra.gmra.mxu3 %v617_v21 }
 0x140   : > { %v344_v23 = vpop.f32.mrf.mxu0  ;;  %v367_v25 = vpop.f32.mrf.mxu1 }
 0x141   : > { %v345_v24 = vadd.f32 %v618_v22, %v344_v23 }
 0x143   : > { %v368_v26 = vadd.f32 %v367_v25, %v345_v24 }
 0x145   : > { %373 = vst [vmem:[%s185_s7] sm:$0xff] %v368_v26 }
 0x14e   : > { %v347_v27 = vpop.f32.mrf.mxu2  ;;  %v370_v29 = vpop.f32.mrf.mxu3 }
 0x14f   : > { %v348_v28 = vadd.f32 %v618_v22, %v347_v27 }
 0x151   : > { %v371_v30 = vadd.f32 %v370_v29, %v348_v28 }
 0x153   : > { %374 = vst [vmem:[%s185_s7 + $0x8] sm:$0xff] %v371_v30 }
 0x154   : > { %646 = shalt.err (!%p643_p5)
}
 0x155   : > { %s699_s29 = smov 128   ;;  %s700_s5 = smov 8  }
 0x156   : > { %519 = dma.vmem_to_hbm [thread:$0]  (%p761_p4), %s391_s18, 256, %s393_s19, %s376_s21, %s699_s29, %s699_s29, %s700_s5  }
 0x157 PF: > { %p525_p6 = scmp.ge.s32.totalorder %s697_s17, 2  ;;  %s407_s6 = sand.u32 1, %s677_s12  }
 0x158   : > { %s408_s7 = scalar_lea.sflag [#allocation3], %s407_s6 }
 0x159   : > { %p522_p7 = pnand %p525_p6, %p768_p8 }
 0x15b   : > { %p523_p9 = pneg %p522_p7 }
 0x15d   : > { %672 = dma.done.wait (%p523_p9), %s408_s7, 256  }
 0x15e   : > { %674 = vsyncadd (%p523_p9), %s408_s7, 4294967040  ;;  %s16_s17 = sadd.s32 1, %s697_s17   ;;  %s957_s12 = smov %s681_s13 }
 0x15f   : > { %p13_p10 = scmp.ge.s32.totalorder %s16_s17, 4   ;;  %s958_s13 = smov %s685_s14 }
 0x160   : > { %s959_s14 = smov %s774_s25  ;;  %s960_s15 = smov %s693_s16 }
 0x161   : > { %s961_s16 = smov %s963_s20  ;;  %15 = sbr.rel (!%p13_p10) target bundleno = 4 (0x4), region = 67 }
 0x166   :  { %414 = vsyncpa [#allocation3], 1 }
 0x167   :  { %416 = vsyncpa [#allocation3 + $0x1], 1 }

</bundles_post_ra>
